<compile_context>
chip_gen: v6e
topology: v6e:2x2x1
jax: 0.10.0
libtpu: 0.0.40
codegen_flags: <defaults>
</compile_context>

<pallas_src>
import jax
import jax.numpy as jnp
from jax.experimental import pallas as pl
from jax.experimental.pallas import tpu as pltpu

LANE = 128
NEG_BIG = -1e30        # effectively -inf for the baked-in softmax mask
MAX_TILE_B = 1024      # batch rows per grid step; far under VMEM on v5e/v6e/v7x


def _round_up(n, m):
    return ((n + m - 1) // m) * m


def _cdiv(a, b):
    return -(-a // b)


def _num_tc_splits():
    """>=2 parallel grid steps on v7x (2 TensorCores/chip); 1 big step on v5e/v6e."""
    try:
        kind = jax.devices()[0].device_kind.lower()
    except Exception:
        return 1
    return 2 if ("v7" in kind or "7x" in kind) else 1


def _choose_tiling(batch, n_splits):
    steps = max(n_splits, _cdiv(batch, MAX_TILE_B))
    tile_b = _round_up(_cdiv(batch, steps), 16)   # 16: bf16 sublane-pack friendly
    steps = _cdiv(batch, tile_b)
    b_pad = tile_b * steps
    return tile_b, steps, b_pad


def make_actor_kernel(num_layers):
    """Fused Linear->ReLU chain + softmax. bf16 MXU operands, f32 accumulation."""

    def kernel(*refs):
        # refs = (x_ref, w0, b0, w1, b1, ..., w_{L-1}, b_{L-1}, out_ref)
        x_ref, out_ref = refs[0], refs[-1]
        param_refs = refs[1:-1]

        h = x_ref[...]                               # bf16 [TILE_B, in_dim]
        for i in range(num_layers):
            w = param_refs[2 * i][...]               # bf16 [in, out]
            b = param_refs[2 * i + 1][...]           # f32  [1, out] -> broadcasts over batch
            h = jnp.dot(h, w, preferred_element_type=jnp.float32) + b
            if i < num_layers - 1:
                # ReLU in f32 (VPU), cast back to bf16 for the next MXU pass.
                h = jnp.maximum(h, 0.0).astype(jnp.bfloat16)

        # Numerically-stable softmax over the last dim (matches F.softmax(x, dim=-1)).
        # Padded logit columns hold NEG_BIG (baked into the last bias) -> zero mass.
        m = jnp.max(h, axis=-1, keepdims=True)
        e = jnp.exp(h - m)
        s = jnp.sum(e, axis=-1, keepdims=True)
        out_ref[...] = (e / s).astype(out_ref.dtype)

    return kernel


def pad_params(params):
    """One-time prep: bf16 weights, f32 biases.  Only the last layer is lane-padded on its
    output dim, with the softmax mask (NEG_BIG) baked into the padded bias columns."""
    padded = []
    n = len(params)
    for i, (w, b) in enumerate(params):
        fi, fo = w.shape
        if i == n - 1 and fo % LANE != 0:
            fo_p = _round_up(fo, LANE)
            w_p = jnp.zeros((fi, fo_p), jnp.float32).at[:, :fo].set(w)
            # Baked-in softmax mask is only correct if padded weight columns are exactly 0.
            assert bool(jnp.all(w_p[:, fo:] == 0.0)), "padded weight columns must be zero"
            b_p = jnp.full((1, fo_p), NEG_BIG, jnp.float32).at[:, :fo].set(b)
        else:
            w_p, b_p = w, b
        padded.append((w_p.astype(jnp.bfloat16), b_p.astype(jnp.float32)))
    return padded


def make_actor_forward(params):
    """params: list of (W [in,out] f32, b [1,out] f32) per layer.
    Returns a jitted forward fn: x [B, in] f32 -> probs [B, out] f32."""
    num_layers = len(params)
    in_dim = params[0][0].shape[0]
    out_dim = params[-1][0].shape[1]
    padded_params = pad_params(params)       # hoisted out of the per-call path
    out_pad = padded_params[-1][0].shape[1]
    n_splits = _num_tc_splits()
    kernel = make_actor_kernel(num_layers)

    def forward(x):
        B = x.shape[0]
        tile_b, steps, b_pad = _choose_tiling(B, n_splits)

        # Cast to bf16 (and pad the batch dim if needed) in one copy; fuses under jit.
        x_b = x.astype(jnp.bfloat16)
        if b_pad != B:
            x_b = jnp.zeros((b_pad, in_dim), jnp.bfloat16).at[:B].set(x_b)

        flat_inputs = [x_b]
        in_specs = [pl.BlockSpec((tile_b, in_dim), lambda i: (i, 0))]
        for w_p, b_p in padded_params:
            flat_inputs += [w_p, b_p]
            # Constant index_maps -> weights/biases stay VMEM-resident across grid steps.
            in_specs.append(pl.BlockSpec(w_p.shape, lambda i: (0, 0)))
            in_specs.append(pl.BlockSpec(b_p.shape, lambda i: (0, 0)))

        out_padded = pl.pallas_call(
            kernel,
            out_shape=jax.ShapeDtypeStruct((b_pad, out_pad), jnp.float32),
            grid=(steps,),
            in_specs=in_specs,
            out_specs=pl.BlockSpec((tile_b, out_pad), lambda i: (i, 0)),
            compiler_params=pltpu.CompilerParams(
                dimension_semantics=("parallel",)),
        )(*flat_inputs)

        return out_padded[:B, :out_dim]

    return jax.jit(forward)


def init_actor_params(key, net_size):
    """Deterministic init mimicking nn.Linear: U(-1/sqrt(fan_in), 1/sqrt(fan_in))."""
    params = []
    for i in range(len(net_size) - 1):
        fan_in, fan_out = net_size[i], net_size[i + 1]
        key, kw, kb = jax.random.split(key, 3)
        bound = 1.0 / (fan_in ** 0.5)
        w = jax.random.uniform(kw, (fan_in, fan_out), jnp.float32, -bound, bound)
        b = jax.random.uniform(kb, (1, fan_out), jnp.float32, -bound, bound)
        params.append((w, b))
    return params


def actor_reference(x, params):
    """Pure-JAX f32 reference for correctness check."""
    h = x
    n = len(params)
    for i, (w, b) in enumerate(params):
        h = h @ w + b
        if i < n - 1:
            h = jax.nn.relu(h)
    return jax.nn.softmax(h, axis=-1)


if __name__ == "__main__":
    net_size = [32, 64, 64, 16]   # Actor(net_size): 3 Linear layers -> softmax
    batch = 64

    key = jax.random.PRNGKey(0)
    key, kx = jax.random.split(key)
    x = jax.random.normal(kx, (batch, net_size[0]), jnp.float32)
    params = init_actor_params(key, net_size)

    actor = make_actor_forward(params)   # pads/casts params ONCE, returns jitted forward
    out = jax.block_until_ready(actor(x))

    ref = actor_reference(x, params)
    assert out.shape == (batch, net_size[-1])
    # bf16 MXU operands -> loosened tolerance vs the pure-f32 reference.
    assert jnp.allclose(out, ref, atol=1e-2, rtol=1e-2), "mismatch vs reference"
    # Exact division in the kernel: softmax rows sum to 1 to f32 precision.
    assert jnp.allclose(jnp.sum(out, axis=-1), 1.0, atol=1e-3)

    print("KERNEL_OK")
</pallas_src>

<mosaic_0001>
module attributes {stable_mosaic.version = 11 : i64} {
  func.func @kernel(%arg0: i32, %arg1: memref<64x32xbf16, #tpu.memory_space<vmem>>, %arg2: memref<32x64xbf16, #tpu.memory_space<vmem>>, %arg3: memref<1x64xf32, #tpu.memory_space<vmem>>, %arg4: memref<64x64xbf16, #tpu.memory_space<vmem>>, %arg5: memref<1x64xf32, #tpu.memory_space<vmem>>, %arg6: memref<64x128xbf16, #tpu.memory_space<vmem>>, %arg7: memref<1x128xf32, #tpu.memory_space<vmem>>, %arg8: memref<64x128xf32, #tpu.memory_space<vmem>>) attributes {dimension_semantics = [#tpu.dimension_semantics<parallel>], iteration_bounds = array<i64: 1>, scalar_prefetch = 0 : i64, scratch_operands = 0 : i64, tpu.core_type = #tpu.core_type<tc>, window_params = [{transform_indices = @transform_0, window_bounds = array<i64: 64, 32>}, {pipeline_mode = #tpu.pipeline_mode<synchronous>, transform_indices = @transform_1, window_bounds = array<i64: 32, 64>}, {pipeline_mode = #tpu.pipeline_mode<synchronous>, transform_indices = @transform_2, window_bounds = array<i64: 1, 64>}, {pipeline_mode = #tpu.pipeline_mode<synchronous>, transform_indices = @transform_3, window_bounds = array<i64: 64, 64>}, {pipeline_mode = #tpu.pipeline_mode<synchronous>, transform_indices = @transform_4, window_bounds = array<i64: 1, 64>}, {pipeline_mode = #tpu.pipeline_mode<synchronous>, transform_indices = @transform_5, window_bounds = array<i64: 64, 128>}, {pipeline_mode = #tpu.pipeline_mode<synchronous>, transform_indices = @transform_6, window_bounds = array<i64: 1, 128>}, {transform_indices = @transform_7, window_bounds = array<i64: 64, 128>}]} {
    %c0 = arith.constant 0 : index
    %c0_0 = arith.constant 0 : index
    %0 = vector.load %arg1[%c0, %c0_0] : memref<64x32xbf16, #tpu.memory_space<vmem>>, vector<64x32xbf16>
    %c0_1 = arith.constant 0 : index
    %c0_2 = arith.constant 0 : index
    %1 = vector.load %arg2[%c0_1, %c0_2] : memref<32x64xbf16, #tpu.memory_space<vmem>>, vector<32x64xbf16>
    %c0_3 = arith.constant 0 : index
    %c0_4 = arith.constant 0 : index
    %2 = vector.load %arg3[%c0_3, %c0_4] : memref<1x64xf32, #tpu.memory_space<vmem>>, vector<1x64xf32>
    %cst = arith.constant dense<0.000000e+00> : vector<64x64xf32>
    %3 = tpu.matmul %0, %1, %cst {dimension_numbers = #tpu.dot_dimension_numbers<[1], [0], [0], [1], [0, 0, 1, 1], [], []>} : vector<64x32xbf16>, vector<32x64xbf16>, vector<64x64xf32> -> vector<64x64xf32>
    %4 = vector.broadcast %2 : vector<1x64xf32> to vector<64x64xf32>
    %5 = arith.addf %3, %4 : vector<64x64xf32>
    %cst_5 = arith.constant 0.000000e+00 : f32
    %6 = vector.broadcast %cst_5 : f32 to vector<64x64xf32>
    %7 = arith.maximumf %5, %6 : vector<64x64xf32>
    %8 = arith.truncf %7 : vector<64x64xf32> to vector<64x64xbf16>
    %c0_6 = arith.constant 0 : index
    %c0_7 = arith.constant 0 : index
    %9 = vector.load %arg4[%c0_6, %c0_7] : memref<64x64xbf16, #tpu.memory_space<vmem>>, vector<64x64xbf16>
    %c0_8 = arith.constant 0 : index
    %c0_9 = arith.constant 0 : index
    %10 = vector.load %arg5[%c0_8, %c0_9] : memref<1x64xf32, #tpu.memory_space<vmem>>, vector<1x64xf32>
    %cst_10 = arith.constant dense<0.000000e+00> : vector<64x64xf32>
    %11 = tpu.matmul %8, %9, %cst_10 {dimension_numbers = #tpu.dot_dimension_numbers<[1], [0], [0], [1], [0, 0, 1, 1], [], []>} : vector<64x64xbf16>, vector<64x64xbf16>, vector<64x64xf32> -> vector<64x64xf32>
    %12 = vector.broadcast %10 : vector<1x64xf32> to vector<64x64xf32>
    %13 = arith.addf %11, %12 : vector<64x64xf32>
    %cst_11 = arith.constant 0.000000e+00 : f32
    %14 = vector.broadcast %cst_11 : f32 to vector<64x64xf32>
    %15 = arith.maximumf %13, %14 : vector<64x64xf32>
    %16 = arith.truncf %15 : vector<64x64xf32> to vector<64x64xbf16>
    %c0_12 = arith.constant 0 : index
    %c0_13 = arith.constant 0 : index
    %17 = vector.load %arg6[%c0_12, %c0_13] : memref<64x128xbf16, #tpu.memory_space<vmem>>, vector<64x128xbf16>
    %c0_14 = arith.constant 0 : index
    %c0_15 = arith.constant 0 : index
    %18 = vector.load %arg7[%c0_14, %c0_15] : memref<1x128xf32, #tpu.memory_space<vmem>>, vector<1x128xf32>
    %cst_16 = arith.constant dense<0.000000e+00> : vector<64x128xf32>
    %19 = tpu.matmul %16, %17, %cst_16 {dimension_numbers = #tpu.dot_dimension_numbers<[1], [0], [0], [1], [0, 0, 1, 1], [], []>} : vector<64x64xbf16>, vector<64x128xbf16>, vector<64x128xf32> -> vector<64x128xf32>
    %20 = vector.broadcast %18 : vector<1x128xf32> to vector<64x128xf32>
    %21 = arith.addf %19, %20 : vector<64x128xf32>
    %cst_17 = arith.constant dense<0xFF800000> : vector<64xf32>
    %22 = vector.multi_reduction <maximumf>, %21, %cst_17 [1] : vector<64x128xf32> to vector<64xf32>
    %23 = vector.shape_cast %22 : vector<64xf32> to vector<64x1xf32>
    %24 = vector.broadcast %23 : vector<64x1xf32> to vector<64x128xf32>
    %25 = arith.subf %21, %24 : vector<64x128xf32>
    %26 = math.exp %25 : vector<64x128xf32>
    %cst_18 = arith.constant dense<0.000000e+00> : vector<64xf32>
    %27 = vector.multi_reduction <add>, %26, %cst_18 [1] : vector<64x128xf32> to vector<64xf32>
    %28 = vector.shape_cast %27 : vector<64xf32> to vector<64x1xf32>
    %29 = vector.broadcast %28 : vector<64x1xf32> to vector<64x128xf32>
    %30 = arith.divf %26, %29 : vector<64x128xf32>
    %c0_19 = arith.constant 0 : index
    %c0_20 = arith.constant 0 : index
    %31 = vector.load %arg8[%c0_19, %c0_20] : memref<64x128xf32, #tpu.memory_space<vmem>>, vector<64x128xf32>
    tpu.vector_store %arg8[%c0_19, %c0_20], %30 {strides = array<i32>} : memref<64x128xf32, #tpu.memory_space<vmem>>, vector<64x128xf32>,
    return
  }
  func.func @transform_0(%arg0: i32) -> (i32, i32) {
    %c0_i32 = arith.constant 0 : i32
    %c0_i32_0 = arith.constant 0 : i32
    return %arg0, %c0_i32 : i32, i32
  }
  func.func @transform_1(%arg0: i32) -> (i32, i32) {
    %c0_i32 = arith.constant 0 : i32
    %c0_i32_0 = arith.constant 0 : i32
    %c0_i32_1 = arith.constant 0 : i32
    return %c0_i32, %c0_i32_0 : i32, i32
  }
  func.func @transform_2(%arg0: i32) -> (i32, i32) {
    %c0_i32 = arith.constant 0 : i32
    %c0_i32_0 = arith.constant 0 : i32
    %c0_i32_1 = arith.constant 0 : i32
    return %c0_i32, %c0_i32_0 : i32, i32
  }
  func.func @transform_3(%arg0: i32) -> (i32, i32) {
    %c0_i32 = arith.constant 0 : i32
    %c0_i32_0 = arith.constant 0 : i32
    %c0_i32_1 = arith.constant 0 : i32
    return %c0_i32, %c0_i32_0 : i32, i32
  }
  func.func @transform_4(%arg0: i32) -> (i32, i32) {
    %c0_i32 = arith.constant 0 : i32
    %c0_i32_0 = arith.constant 0 : i32
    %c0_i32_1 = arith.constant 0 : i32
    return %c0_i32, %c0_i32_0 : i32, i32
  }
  func.func @transform_5(%arg0: i32) -> (i32, i32) {
    %c0_i32 = arith.constant 0 : i32
    %c0_i32_0 = arith.constant 0 : i32
    %c0_i32_1 = arith.constant 0 : i32
    return %c0_i32, %c0_i32_0 : i32, i32
  }
  func.func @transform_6(%arg0: i32) -> (i32, i32) {
    %c0_i32 = arith.constant 0 : i32
    %c0_i32_0 = arith.constant 0 : i32
    %c0_i32_1 = arith.constant 0 : i32
    return %c0_i32, %c0_i32_0 : i32, i32
  }
  func.func @transform_7(%arg0: i32) -> (i32, i32) {
    %c0_i32 = arith.constant 0 : i32
    %c0_i32_0 = arith.constant 0 : i32
    return %arg0, %c0_i32 : i32, i32
  }
}

</mosaic_0001>

<bundles_post_ra>
// kernel: forward.1
= control target key start
LH: loop header
LB: loop body
LE: loop exit
PB: predicated region body
PF: predicated region fallthrough
CT: control target
= control target key end

     0   :  { %vm78_vm0 = vcmask 261120   ;;  %vm207_vm1 = vcmask 523264   ;;  %s765_s1 = inlined_call_operand.vmem [shape: bf16[32,64], index: 1, kind: input, shape index: {}]   ;;  %s766_s0 = inlined_call_operand.vmem [shape: bf16[64,32], index: 0, kind: input, shape index: {}]   ;;  %s767_s3 = inlined_call_operand.vmem [shape: bf16[64,64], index: 3, kind: input, shape index: {}]   ;;  %s768_s5 = inlined_call_operand.vmem [shape: bf16[64,128], index: 5, kind: input, shape index: {}]   ;;  %s769_s2 = inlined_call_operand.vmem [shape: f32[1,64], index: 2, kind: input, shape index: {}]   ;;  %s770_s4 = inlined_call_operand.vmem [shape: f32[1,64], index: 4, kind: input, shape index: {}]   ;;  %s771_s6 = inlined_call_operand.vmem [shape: f32[1,128], index: 6, kind: input, shape index: {}]   ;;  %s772_s7 = inlined_call_operand.vmem [shape: f32[64,128], index: 7, kind: output, shape index: {}]  }
   0x1   :  { %v592_v0 = vld [vmem:[%s765_s1 + $0x8] sm:$0xff]   ;;  %v593_v1 = vld [vmem:[%s765_s1] sm:$0xff]   ;;  %v596_v4 = vld [vmem:[%s766_s0 + $0x10] sm:$0xff]  }
   0x2   :  { %548 = vmatprep.subr.bf16.mxu0 %v592_v0  ;;  %v594_v2 = vld [vmem:[%s766_s0] sm:$0xff]   ;;  %v595_v3 = vld [vmem:[%s766_s0 + $0x8] sm:$0xff]   ;;  %v598_v5 = vld [vmem:[%s767_s3 + $0x18] sm:$0xff]  }
   0x3   :  { %549 = vmatpush3.bf16.msra.mxu0 %v592_v0  ;;  %552 = vmatprep.mubr.msk.bf16.mxu0 %vm78_vm0, %v594_v2  ;;  %v597_v6 = vld [vmem:[%s766_s0 + $0x18] sm:$0xff]   ;;  %v599_v7 = vld [vmem:[%s767_s3 + $0x10] sm:$0xff]   ;;  %v600_v8 = vld [vmem:[%s767_s3 + $0x8] sm:$0xff]  }
   0x4   :  { %550 = vmatprep.subr.bf16.mxu0 %v593_v1  ;;  %560 = vmatprep.subr.bf16.mxu1 %v598_v5  ;;  %v601_v9 = vld [vmem:[%s767_s3] sm:$0xff]   ;;  %v602_v10 = vld [vmem:[%s768_s5 + $0x18] sm:$0xff]   ;;  %v603_v40 = vld [vmem:[%s768_s5 + $0x10] sm:$0xff]  }
   0x5   :  { %561 = vmatpush3.bf16.msra.mxu1 %v598_v5  ;;  %v497_v13 = vld [vmem:[%s769_s2] ss:$0 sm:$0xff]  ;;  %v604_v41 = vld [vmem:[%s768_s5 + $0x8] sm:$0xff]  }
   0x6   :  { %562 = vmatprep.subr.bf16.mxu1 %v599_v7  ;;  %v605_v42 = vld [vmem:[%s768_s5] sm:$0xff]  }
   0x7   :  { %551 = vmatpush3.bf16.msra.mxu0 %v593_v1  ;;  %v508_v45 = vld [vmem:[%s770_s4] ss:$0 sm:$0xff] }
   0x8   :  { %576 = vmatprep.subr.bf16.mxu0 %v602_v10 }
   0x9   :  { %563 = vmatpush3.bf16.msra.mxu1 %v599_v7 }
   0xa   :  { %553 = vmatmul.mubr.msk.bf16.vlgmr.msra.gmra.mxu0 %vm78_vm0, %v595_v3  ;;  %564 = vmatprep.subr.bf16.mxu1 %v600_v8 }
   0xb   :  { %556 = vmatprep.mubr.msk.bf16.mxu0 %vm78_vm0, %v596_v4  ;;  %577 = vmatpush3.bf16.msra.mxu0 %v602_v10 }
   0xc   :  { %578 = vmatprep.subr.bf16.mxu0 %v603_v40 }
   0xd   :  { %565 = vmatpush3.bf16.msra.mxu1 %v600_v8  ;;  %v517_v8 = vld [vmem:[%s771_s6] ss:$0 sm:$0xff] }
   0xe   :  { %566 = vmatprep.subr.bf16.mxu1 %v601_v9 }
   0xf   :  { %579 = vmatpush3.bf16.msra.mxu0 %v603_v40 }
  0x10   :  { %580 = vmatprep.subr.bf16.mxu0 %v604_v41 }
  0x11   :  { %567 = vmatpush3.bf16.msra.mxu1 %v601_v9 }
  0x12   :  { %557 = vmatmul.mubr.msk.bf16.gmra.mxu0 %vm78_vm0, %v597_v6 }
  0x13   :  { %581 = vmatpush3.bf16.msra.mxu0 %v604_v41 }
  0x14   :  { %582 = vmatprep.subr.bf16.mxu0 %v605_v42 }
  0x17   :  { %583 = vmatpush3.bf16.msra.mxu0 %v605_v42 }
  0xca   :  { %v554_v11 = vpop.f32.mrf.mxu0 }
  0xcb   :  { %v134_v17 = vadd.f32 %v554_v11, %v497_v13 }
  0xcc   :  { %v125_v12 = vpop.f32.mrf.mxu0 }
  0xcd   :  { %v126_v15 = vadd.f32 %v497_v13, %v125_v12  ;;  %v158_v24 = vmax.f32 %v134_v17, 0.0 }
  0xce   :  { %v555_v14 = vpop.f32.mrf.mxu0 }
  0xcf   :  { %v137_v16 = vadd.f32 %v555_v14, %v497_v13  ;;  %v156_v22 = vmax.f32 %v126_v15, 0.0 }
  0xd0   :  { %v128_v18 = vpop.f32.mrf.mxu0 }
  0xd1   :  { %v129_v19 = vadd.f32 %v497_v13, %v128_v18  ;;  %v159_v20 = vmax.f32 %v137_v16, 0.0 }
  0xd2   :  { %v558_v21 = vpop.f32.mrf.mxu0 }
  0xd3   :  { %v157_v23 = vmax.f32 %v129_v19, 0.0  ;;  %v165_v27 = vpack.c.bf16 %v159_v20, %v158_v24  ;;  %v150_v31 = vadd.f32 %v558_v21, %v497_v13 }
  0xd4   :  { %v141_v25 = vpop.f32.mrf.mxu0 }
  0xd5   :  { %v164_v26 = vpack.c.bf16 %v157_v23, %v156_v22  ;;  %v142_v29 = vadd.f32 %v497_v13, %v141_v25  ;;  %v162_v37 = vmax.f32 %v150_v31, 0.0 }
  0xd6   :  { %v559_v28 = vpop.f32.mrf.mxu0 }
  0xd7   :  { %v153_v30 = vadd.f32 %v559_v28, %v497_v13  ;;  %568 = vmatprep.mubr.msk.bf16.mxu1 %vm207_vm1, %v164_v26  ;;  %v160_v35 = vmax.f32 %v142_v29, 0.0 }
  0xd8   :  { %v144_v32 = vpop.f32.mrf.mxu0  ;;  %569 = vmatmul.mubr.msk.bf16.vlgmr.msra.gmra.mxu1 %vm207_vm1, %v165_v27 }
  0xd9   :  { %v145_v33 = vadd.f32 %v497_v13, %v144_v32  ;;  %v163_v34 = vmax.f32 %v153_v30, 0.0 }
  0xdb   :  { %v161_v36 = vmax.f32 %v145_v33, 0.0  ;;  %v167_v39 = vpack.c.bf16 %v163_v34, %v162_v37 }
  0xdd   :  { %v166_v38 = vpack.c.bf16 %v161_v36, %v160_v35 }
  0xdf   :  { %572 = vmatprep.mubr.msk.bf16.mxu1 %vm207_vm1, %v166_v38 }
  0xe0   :  { %573 = vmatmul.mubr.msk.bf16.gmra.mxu1 %vm207_vm1, %v167_v39 }
 0x198   :  { %v570_v43 = vpop.f32.mrf.mxu1 }
 0x199   :  { %v263_v49 = vadd.f32 %v570_v43, %v508_v45 }
 0x19a   :  { %v254_v44 = vpop.f32.mrf.mxu1 }
 0x19b   :  { %v255_v47 = vadd.f32 %v508_v45, %v254_v44  ;;  %v287_v56 = vmax.f32 %v263_v49, 0.0 }
 0x19c   :  { %v571_v46 = vpop.f32.mrf.mxu1 }
 0x19d   :  { %v266_v48 = vadd.f32 %v571_v46, %v508_v45  ;;  %v285_v54 = vmax.f32 %v255_v47, 0.0 }
 0x19e   :  { %v257_v50 = vpop.f32.mrf.mxu1 }
 0x19f   :  { %v258_v51 = vadd.f32 %v508_v45, %v257_v50  ;;  %v288_v52 = vmax.f32 %v266_v48, 0.0 }
 0x1a0   :  { %v574_v53 = vpop.f32.mrf.mxu1 }
 0x1a1   :  { %v286_v55 = vmax.f32 %v258_v51, 0.0  ;;  %v294_v59 = vpack.c.bf16 %v288_v52, %v287_v56  ;;  %v279_v63 = vadd.f32 %v574_v53, %v508_v45 }
 0x1a2   :  { %v270_v57 = vpop.f32.mrf.mxu1 }
 0x1a3   :  { %v293_v58 = vpack.c.bf16 %v286_v55, %v285_v54  ;;  %v271_v61 = vadd.f32 %v508_v45, %v270_v57  ;;  %v291_v5 = vmax.f32 %v279_v63, 0.0 }
 0x1a4   :  { %v575_v60 = vpop.f32.mrf.mxu1 }
 0x1a5   :  { %v282_v62 = vadd.f32 %v575_v60, %v508_v45  ;;  %584 = vmatprep.mubr.msk.bf16.mxu0 %vm207_vm1, %v293_v58  ;;  %v289_v3 = vmax.f32 %v271_v61, 0.0 }
 0x1a6   :  { %v273_v0 = vpop.f32.mrf.mxu1  ;;  %585 = vmatmul.mubr.msk.bf16.vlgmr.msra.gmra.mxu0 %vm207_vm1, %v294_v59 }
 0x1a7   :  { %v274_v1 = vadd.f32 %v508_v45, %v273_v0  ;;  %v292_v2 = vmax.f32 %v282_v62, 0.0 }
 0x1a9   :  { %v290_v4 = vmax.f32 %v274_v1, 0.0  ;;  %v296_v7 = vpack.c.bf16 %v292_v2, %v291_v5 }
 0x1ab   :  { %v295_v6 = vpack.c.bf16 %v290_v4, %v289_v3 }
 0x1ad   :  { %588 = vmatprep.mubr.msk.bf16.mxu0 %vm207_vm1, %v295_v6 }
 0x1ae   :  { %589 = vmatmul.mubr.msk.bf16.gmra.mxu0 %vm207_vm1, %v296_v7 }
 0x266   :  { %v586_v9 = vpop.f32.mrf.mxu0 }
 0x267   :  { %v391_v10 = vadd.f32 %v586_v9, %v517_v8 }
 0x268   :  { %v382_v11 = vpop.f32.mrf.mxu0 }
 0x269   :  { %v383_v12 = vadd.f32 %v517_v8, %v382_v11  ;;  %417 = vmax.xlane.f32.xlu1 %v391_v10 }
 0x26a   :  { %v587_v13 = vpop.f32.mrf.mxu0 }
 0x26b   :  { %v394_v14 = vadd.f32 %v587_v13, %v517_v8  ;;  %413 = vmax.xlane.f32.xlu0 %v383_v12 }
 0x26c   :  { %v385_v15 = vpop.f32.mrf.mxu0 }
 0x26d   :  { %v386_v16 = vadd.f32 %v517_v8, %v385_v15  ;;  %419 = vmax.xlane.f32.xlu1 %v394_v14 }
 0x26e   :  { %v590_v17 = vpop.f32.mrf.mxu0 }
 0x26f   :  { %415 = vmax.xlane.f32.xlu0 %v386_v16  ;;  %v407_v22 = vadd.f32 %v590_v17, %v517_v8 }
 0x270   :  { %v398_v18 = vpop.f32.mrf.mxu0 }
 0x271   :  { %v399_v19 = vadd.f32 %v517_v8, %v398_v18 }
 0x272   :  { %v591_v20 = vpop.f32.mrf.mxu0 }
 0x273   :  { %421 = vmax.xlane.f32.xlu0 %v399_v19  ;;  %v410_v24 = vadd.f32 %v591_v20, %v517_v8 }
 0x274   :  { %v401_v21 = vpop.f32.mrf.mxu0 }
 0x275   :  { %v402_v23 = vadd.f32 %v517_v8, %v401_v21 }
 0x277   :  { %423 = vmax.xlane.f32.xlu1 %v402_v23  ;;  %425 = vmax.xlane.f32.xlu0 %v407_v22 }
 0x27b   :  { %427 = vmax.xlane.f32.xlu1 %v410_v24 }
 0x2f2   :  { %v418_v25 = vpop.xlane.xlu1 %417 }
 0x2f3   :  { %v431_v26 = vsub.f32 %v391_v10, %v418_v25 }
 0x2f4   :  { %v414_v27 = vpop.xlane.xlu0 %413 }
 0x2f5   :  { %v441_v28 = vmul.f32 1.442695, %v431_v26  ;;  %v429_v29 = vsub.f32 %v383_v12, %v414_v27 }
 0x2f6   :  { %v420_v30 = vpop.xlane.xlu1 %419 }
 0x2f7   :  { %606 = vpow2.f32 %v441_v28  ;;  %v437_v31 = vmul.f32 1.442695, %v429_v29  ;;  %v432_v32 = vsub.f32 %v394_v14, %v420_v30 }
 0x2f8   :  { %v416_v33 = vpop.xlane.xlu0 %415 }
 0x2f9   :  { %v443_v34 = vmul.f32 1.442695, %v432_v32  ;;  %v430_v35 = vsub.f32 %v386_v16, %v416_v33  ;;  %608 = vpow2.f32 %v437_v31 }
 0x2fb   :  { %610 = vpow2.f32 %v443_v34  ;;  %v439_v36 = vmul.f32 1.442695, %v430_v35 }
 0x2fc   :  { %v422_v37 = vpop.xlane.xlu0 %421 }
 0x2fd   :  { %v433_v38 = vsub.f32 %v399_v19, %v422_v37  ;;  %612 = vpow2.f32 %v439_v36 }
 0x2ff   :  { %v445_v39 = vmul.f32 1.442695, %v433_v38 }
 0x300   :  { %v424_v40 = vpop.xlane.xlu1 %423  ;;  %v426_v41 = vpop.xlane.xlu0 %425 }
 0x301   :  { %614 = vpow2.f32 %v445_v39  ;;  %v434_v42 = vsub.f32 %v402_v23, %v424_v40  ;;  %v435_v43 = vsub.f32 %v407_v22, %v426_v41 }
 0x303   :  { %v447_v44 = vmul.f32 1.442695, %v434_v42  ;;  %v449_v45 = vmul.f32 1.442695, %v435_v43 }
 0x304   :  { %v607_v46 = vpop.eup %606  ;;  %v428_v47 = vpop.xlane.xlu1 %427 }
 0x305   :  { %616 = vpow2.f32 %v447_v44  ;;  %v436_v48 = vsub.f32 %v410_v24, %v428_v47  ;;  %457 = vadd.xlane.f32.xlu0 %v607_v46 }
 0x306   :  { %618 = vpow2.f32 %v449_v45  ;;  %v609_v49 = vpop.eup %608 }
 0x307   :  { %v451_v50 = vmul.f32 1.442695, %v436_v48 }
 0x308   :  { %v611_v51 = vpop.eup %610 }
 0x309   :  { %620 = vpow2.f32 %v451_v50  ;;  %459 = vadd.xlane.f32.xlu1 %v611_v51  ;;  %453 = vadd.xlane.f32.xlu0 %v609_v49 }
 0x30a   :  { %v613_v52 = vpop.eup %612 }
 0x30d   :  { %455 = vadd.xlane.f32.xlu1 %v613_v52 }
 0x30e   :  { %v615_v53 = vpop.eup %614 }
 0x30f   :  { %461 = vadd.xlane.f32.xlu0 %v615_v53 }
 0x312   :  { %v617_v54 = vpop.eup %616 }
 0x313   :  { %v619_v55 = vpop.eup %618  ;;  %463 = vadd.xlane.f32.xlu1 %v617_v54 }
 0x314   :  { %465 = vadd.xlane.f32.xlu0 %v619_v55 }
 0x316   :  { %v621_v56 = vpop.eup %620 }
 0x317   :  { %467 = vadd.xlane.f32.xlu1 %v621_v56 }
 0x38e   :  { %v458_v57 = vpop.xlane.xlu0 %457 }
 0x38f   :  { %622 = vrcp.f32 %v458_v57 }
 0x392   :  { %v460_v58 = vpop.xlane.xlu1 %459  ;;  %v454_v59 = vpop.xlane.xlu0 %453 }
 0x393   :  { %624 = vrcp.f32 %v460_v58 }
 0x394   :  { %626 = vrcp.f32 %v454_v59 }
 0x396   :  { %v456_v60 = vpop.xlane.xlu1 %455 }
 0x397   :  { %628 = vrcp.f32 %v456_v60 }
 0x398   :  { %v462_v61 = vpop.xlane.xlu0 %461 }
 0x399   :  { %630 = vrcp.f32 %v462_v61 }
 0x39c   :  { %v623_v62 = vpop.eup %622  ;;  %v464_v63 = vpop.xlane.xlu1 %463 }
 0x39d   :  { %v474_v0 = vmul.f32 %v623_v62, %v607_v46  ;;  %632 = vrcp.f32 %v464_v63  ;;  %v466_v1 = vpop.xlane.xlu0 %465 }
 0x39e   :  { %634 = vrcp.f32 %v466_v1 }
 0x39f   :  { %487 = vst [vmem:[%s772_s7 + $0x10] sm:$0xff] %v474_v0 }
 0x3a0   :  { %v625_v2 = vpop.eup %624  ;;  %v468_v3 = vpop.xlane.xlu1 %467 }
 0x3a1   :  { %v627_v4 = vpop.eup %626  ;;  %v476_v5 = vmul.f32 %v625_v2, %v611_v51  ;;  %636 = vrcp.f32 %v468_v3 }
 0x3a2   :  { %v470_v6 = vmul.f32 %v627_v4, %v609_v49 }
 0x3a3   :  { %488 = vst [vmem:[%s772_s7 + $0x18] sm:$0xff] %v476_v5 }
 0x3a4   :  { %v629_v7 = vpop.eup %628  ;;  %485 = vst [vmem:[%s772_s7] sm:$0xff] %v470_v6 }
 0x3a5   :  { %v472_v8 = vmul.f32 %v629_v7, %v613_v52 }
 0x3a6   :  { %v631_v9 = vpop.eup %630 }
 0x3a7   :  { %486 = vst [vmem:[%s772_s7 + $0x8] sm:$0xff] %v472_v8  ;;  %v478_v10 = vmul.f32 %v631_v9, %v615_v53 }
 0x3a9   :  { %489 = vst [vmem:[%s772_s7 + $0x20] sm:$0xff] %v478_v10 }
 0x3aa   :  { %v633_v11 = vpop.eup %632 }
 0x3ab   :  { %v635_v12 = vpop.eup %634  ;;  %v480_v13 = vmul.f32 %v633_v11, %v617_v54 }
 0x3ac   :  { %v482_v14 = vmul.f32 %v635_v12, %v619_v55 }
 0x3ad   :  { %490 = vst [vmem:[%s772_s7 + $0x28] sm:$0xff] %v480_v13 }
 0x3ae   :  { %v637_v15 = vpop.eup %636  ;;  %491 = vst [vmem:[%s772_s7 + $0x30] sm:$0xff] %v482_v14 }
 0x3af   :  { %v484_v16 = vmul.f32 %v637_v15, %v621_v56 }
 0x3b1   :  { %492 = vst [vmem:[%s772_s7 + $0x38] sm:$0xff] %v484_v16 }

</bundles_post_ra>
